<compile_context>
chip_gen: v7x
topology: tpu7x:2x2x1
jax: 0.10.0
libtpu: 0.0.40
codegen_flags: <defaults>
</compile_context>

<pallas_src>
import functools

import jax
import jax.numpy as jnp
import numpy as np
from jax.experimental import pallas as pl
from jax.experimental.pallas import tpu as pltpu


def _pick_d_chunk(D, cap=512):
    """Largest multiple of 128 that divides D, capped (toy-shape friendly).
    For production-size D (SAM embeds ~1M) raise the cap so grid overhead
    stays negligible while keeping the (tD, N) key chunk VMEM-bounded."""
    if D % 128 != 0:
        return D
    best = 128
    c = 128
    while c <= min(D, cap):
        if D % c == 0:
            best = c
        c += 128
    return best


# ---------------- kernel 1: batched affinity / thresholded logits ----------------
def _logits_kernel(feats_ref,    # (B, tD)  f32  VMEM chunk
                   keys_ref,     # (tD, N)  bf16 VMEM chunk
                   logits_ref,   # (B, N)   f32  output, resident across D-chunks
                   ssq_ref,      # (B, 1)   f32  scratch (sum of squares per row)
                   *, beta):
    d = pl.program_id(0)

    @pl.when(d == 0)
    def _():
        logits_ref[...] = jnp.zeros_like(logits_ref)
        ssq_ref[...] = jnp.zeros_like(ssq_ref)

    f = feats_ref[...]                                       # (B, tD) f32
    # bf16 operands, f32 accumulation on the MXU (no Precision.HIGHEST).
    logits_ref[...] += jnp.dot(f.astype(jnp.bfloat16), keys_ref[...],
                               preferred_element_type=jnp.float32)
    ssq_ref[...] += jnp.sum(f * f, axis=-1, keepdims=True)

    @pl.when(d == pl.num_programs(0) - 1)
    def _():
        # Normalize after the matmul: cache_keys are unit-norm, so
        # (f/||f||) @ K == (f @ K) * rsqrt(sum(f*f)).  rsqrt goes to the EUP.
        aff = logits_ref[...] * jax.lax.rsqrt(ssq_ref[...])
        logits = jnp.exp(beta * (aff - 1.0))                 # == exp(-(beta - beta*aff))
        mean_v = jnp.mean(logits, axis=-1, keepdims=True)
        min_v = jnp.min(logits, axis=-1, keepdims=True)
        logits_ref[...] = jnp.where(logits < mean_v, min_v, logits)


# ---------------- kernel 2: per-row label-gathered weighted mask sum ----------------
def _mask_sum_kernel(label_ref,   # (B,) int32 scalar-prefetch (used only in index_maps)
                     logits_ref,  # (1, N)   f32  VMEM (row b)
                     masks_ref,   # (N, HW)  bf16 VMEM (row picked by label[b])
                     out_ref,     # (1, HW)  f32  VMEM (row b)
                     *, scale):
    del label_ref
    # (1,N)@(N,HW): with small N the MXU K dim is mostly idle, but the per-label
    # gather forces per-row work anyway and this matmul sits under the mask DMA.
    acc = jnp.dot(logits_ref[...].astype(jnp.bfloat16), masks_ref[...],
                  preferred_element_type=jnp.float32)        # (1, HW) f32
    out_ref[...] = acc * scale - 5.0                         # folded 2/3 * 100 / weight


def cache_model_forward(img_embeds, label, cache_keys, ptype_masks,
                        ptype_weight, beta=10.0):
    B = img_embeds.shape[0]
    D = int(np.prod(img_embeds.shape[1:]))
    feats = img_embeds.reshape(B, D)
    if feats.dtype != jnp.float32:
        feats = feats.astype(jnp.float32)

    # Keys / masks should already be stored narrow (bf16) at cache-build time;
    # cast only if the caller hands us something wider.
    keys = cache_keys if cache_keys.dtype == jnp.bfloat16 else cache_keys.astype(jnp.bfloat16)
    P, N, H, W = ptype_masks.shape
    HW = H * W
    masks3 = ptype_masks.reshape(P, N, HW)
    if masks3.dtype != jnp.bfloat16:
        masks3 = masks3.astype(jnp.bfloat16)

    label = label.astype(jnp.int32)
    tD = _pick_d_chunk(D)

    # ---- kernel 1: thresholded logits (B, N) -- one batched MXU matmul ----
    logits = pl.pallas_call(
        functools.partial(_logits_kernel, beta=float(beta)),
        out_shape=jax.ShapeDtypeStruct((B, N), jnp.float32),
        grid_spec=pltpu.PrefetchScalarGridSpec(
            num_scalar_prefetch=0,
            grid=(D // tD,),
            in_specs=[
                pl.BlockSpec((B, tD), lambda d: (0, d)),     # feats D-chunk
                pl.BlockSpec((tD, N), lambda d: (d, 0)),     # keys D-chunk (bf16)
            ],
            out_specs=pl.BlockSpec((B, N), lambda d: (0, 0)),
            scratch_shapes=[pltpu.VMEM((B, 1), jnp.float32)],
        ),
        compiler_params=pltpu.CompilerParams(
            dimension_semantics=("arbitrary",),              # D is a reduction axis
            vmem_limit_bytes=32 * 1024 * 1024),
    )(feats, keys)

    # ---- kernel 2: weighted mask sum per batch row (parallel over B) ----
    scale = (200.0 / 3.0) / float(ptype_weight)              # folds 2/3 * 100 / weight
    out3 = pl.pallas_call(
        functools.partial(_mask_sum_kernel, scale=scale),
        out_shape=jax.ShapeDtypeStruct((B, 1, HW), jnp.float32),
        grid_spec=pltpu.PrefetchScalarGridSpec(
            num_scalar_prefetch=1,
            grid=(B,),
            in_specs=[
                pl.BlockSpec((pl.Squeezed(), 1, N), lambda b, lbl: (b, 0, 0)),
                pl.BlockSpec((pl.Squeezed(), N, HW), lambda b, lbl: (lbl[b], 0, 0)),
            ],
            out_specs=pl.BlockSpec((pl.Squeezed(), 1, HW), lambda b, lbl: (b, 0, 0)),
        ),
        compiler_params=pltpu.CompilerParams(
            dimension_semantics=("parallel",),               # per-row output block
            vmem_limit_bytes=32 * 1024 * 1024),
    )(label, logits.reshape(B, 1, N), masks3)

    return out3.reshape(B, H, W)


def reference_forward(img_embeds, label, cache_keys, ptype_masks,
                      ptype_weight, beta=10.0):
    """Pure-JAX f32 replica of the PyTorch forward (is_train=False, batched label)."""
    B = img_embeds.shape[0]
    feats = img_embeds.reshape(B, -1)
    feats = feats / jnp.linalg.norm(feats, axis=-1, keepdims=True)
    aff = jnp.dot(feats, cache_keys, precision=jax.lax.Precision.HIGHEST)
    logits = jnp.exp(-1.0 * (beta - beta * aff))
    mean_v = jnp.mean(logits, axis=1, keepdims=True)
    min_v = jnp.min(logits, axis=1, keepdims=True)
    logits = jnp.where(logits < mean_v, min_v, logits)
    target = ptype_masks[label]                              # (B, N, H, W)
    masks = logits[:, :, None, None] * target
    final = jnp.sum(masks, axis=1) / ptype_weight
    return 2.0 / 3.0 * final * 100.0 - 5.0


if __name__ == "__main__":
    key = jax.random.PRNGKey(0)
    B, C, Hc, Wc = 2, 4, 16, 16         # img_embeds: (B, C, Hc, Wc), NCHW
    D = C * Hc * Wc                      # flattened feature dim (1024)
    P, N = 4, 16                         # num ptype classes, cache size
    MS = 16                              # mask_size (= img_size // 4 in the module)

    k1, k2, k3 = jax.random.split(key, 3)

    img_embeds = jax.random.normal(k1, (B, C, Hc, Wc), dtype=jnp.float32)

    # cache_keys: unit-norm cached features, stored as (D, N) (post permute(1,0))
    raw = jax.random.normal(k2, (N, D), dtype=jnp.float32)
    raw = raw / jnp.linalg.norm(raw, axis=-1, keepdims=True)
    cache_keys = raw.T                                       # (D, N)

    # ptype_masks: image-like values in [0, 255]; zero some cache slots so
    # ptype_weight (= count of non-empty masks) is non-trivial.
    ptype_masks = jax.random.uniform(k3, (P, N, MS, MS), dtype=jnp.float32) * 255.0
    empty_slots = (jnp.arange(N) % 4 == 0).astype(jnp.float32)
    ptype_masks = ptype_masks * (1.0 - empty_slots)[None, :, None, None]
    # one-time host scalar (as in build_ptype_masks); hoist out of any serving loop
    ptype_weight = int(jnp.sum(jnp.sum(ptype_masks, axis=(2, 3)) > 0))

    label = jnp.array([1, 3], dtype=jnp.int32)
    beta = 10.0

    # Cast cache tensors to bf16 once (simulating cache-build-time storage),
    # so the kernel's HBM streams stay narrow.
    cache_keys_bf16 = cache_keys.astype(jnp.bfloat16)
    ptype_masks_bf16 = ptype_masks.astype(jnp.bfloat16)

    out = cache_model_forward(img_embeds, label, cache_keys_bf16,
                              ptype_masks_bf16, ptype_weight, beta)
    out = jax.block_until_ready(out)

    ref = reference_forward(img_embeds, label, cache_keys, ptype_masks,
                            ptype_weight, beta)
    # bf16 MXU operands (f32 accumulation) vs the f32 HIGHEST reference:
    # tolerances widened accordingly.
    np.testing.assert_allclose(np.asarray(out), np.asarray(ref),
                               rtol=2e-2, atol=0.1)
    print("KERNEL_OK")
</pallas_src>

<mosaic_0001>
module attributes {stable_mosaic.version = 11 : i64} {
  func.func @_logits_kernel(%arg0: i32, %arg1: memref<2x512xf32, #tpu.memory_space<vmem>>, %arg2: memref<512x16xbf16, #tpu.memory_space<vmem>>, %arg3: memref<2x16xf32, #tpu.memory_space<vmem>>, %arg4: memref<2x1xf32, #tpu.memory_space<vmem>>) attributes {dimension_semantics = [#tpu.dimension_semantics<arbitrary>], iteration_bounds = array<i64: 2>, scalar_prefetch = 0 : i64, scratch_operands = 1 : i64, tpu.core_type = #tpu.core_type<tc>, window_params = [{transform_indices = @transform_0, window_bounds = array<i64: 2, 512>}, {transform_indices = @transform_1, window_bounds = array<i64: 512, 16>}, {pipeline_mode = #tpu.pipeline_mode<synchronous>, transform_indices = @transform_2, window_bounds = array<i64: 2, 16>}]} {
    %c0_i32 = arith.constant 0 : i32
    %0 = arith.cmpi eq, %arg0, %c0_i32 : i32
    %1 = arith.extui %0 : i1 to i32
    %c0_i32_0 = arith.constant 0 : i32
    %2 = arith.cmpi ne, %1, %c0_i32_0 : i32
    scf.if %2 {
      %cst_14 = arith.constant 0.000000e+00 : f32
      %19 = vector.broadcast %cst_14 : f32 to vector<2x16xf32>
      %c0_15 = arith.constant 0 : index
      %c0_16 = arith.constant 0 : index
      %20 = vector.load %arg3[%c0_15, %c0_16] : memref<2x16xf32, #tpu.memory_space<vmem>>, vector<2x16xf32>
      tpu.vector_store %arg3[%c0_15, %c0_16], %19 {strides = array<i32>} : memref<2x16xf32, #tpu.memory_space<vmem>>, vector<2x16xf32>,
      %cst_17 = arith.constant 0.000000e+00 : f32
      %21 = vector.broadcast %cst_17 : f32 to vector<2x1xf32>
      %c0_18 = arith.constant 0 : index
      %c0_19 = arith.constant 0 : index
      %22 = vector.load %arg4[%c0_18, %c0_19] : memref<2x1xf32, #tpu.memory_space<vmem>>, vector<2x1xf32>
      tpu.vector_store %arg4[%c0_18, %c0_19], %21 {strides = array<i32>} : memref<2x1xf32, #tpu.memory_space<vmem>>, vector<2x1xf32>,
    } else {
    }
    %c0 = arith.constant 0 : index
    %c0_1 = arith.constant 0 : index
    %3 = vector.load %arg1[%c0, %c0_1] : memref<2x512xf32, #tpu.memory_space<vmem>>, vector<2x512xf32>
    %c0_2 = arith.constant 0 : index
    %c0_3 = arith.constant 0 : index
    %4 = vector.load %arg3[%c0_2, %c0_3] : memref<2x16xf32, #tpu.memory_space<vmem>>, vector<2x16xf32>
    %5 = arith.truncf %3 : vector<2x512xf32> to vector<2x512xbf16>
    %c0_4 = arith.constant 0 : index
    %c0_5 = arith.constant 0 : index
    %6 = vector.load %arg2[%c0_4, %c0_5] : memref<512x16xbf16, #tpu.memory_space<vmem>>, vector<512x16xbf16>
    %cst = arith.constant dense<0.000000e+00> : vector<2x16xf32>
    %7 = tpu.matmul %5, %6, %cst {dimension_numbers = #tpu.dot_dimension_numbers<[1], [0], [0], [1], [0, 0, 1, 1], [], []>} : vector<2x512xbf16>, vector<512x16xbf16>, vector<2x16xf32> -> vector<2x16xf32>
    %8 = arith.addf %4, %7 : vector<2x16xf32>
    %c0_6 = arith.constant 0 : index
    %c0_7 = arith.constant 0 : index
    %9 = vector.load %arg3[%c0_6, %c0_7] : memref<2x16xf32, #tpu.memory_space<vmem>>, vector<2x16xf32>
    tpu.vector_store %arg3[%c0_6, %c0_7], %8 {strides = array<i32>} : memref<2x16xf32, #tpu.memory_space<vmem>>, vector<2x16xf32>,
    %c0_8 = arith.constant 0 : index
    %c0_9 = arith.constant 0 : index
    %10 = vector.load %arg4[%c0_8, %c0_9] : memref<2x1xf32, #tpu.memory_space<vmem>>, vector<2x1xf32>
    %11 = arith.mulf %3, %3 : vector<2x512xf32>
    %cst_10 = arith.constant dense<0.000000e+00> : vector<2xf32>
    %12 = vector.multi_reduction <add>, %11, %cst_10 [1] : vector<2x512xf32> to vector<2xf32>
    %13 = vector.shape_cast %12 : vector<2xf32> to vector<2x1xf32>
    %14 = arith.addf %10, %13 : vector<2x1xf32>
    %c0_11 = arith.constant 0 : index
    %c0_12 = arith.constant 0 : index
    %15 = vector.load %arg4[%c0_11, %c0_12] : memref<2x1xf32, #tpu.memory_space<vmem>>, vector<2x1xf32>
    tpu.vector_store %arg4[%c0_11, %c0_12], %14 {strides = array<i32>} : memref<2x1xf32, #tpu.memory_space<vmem>>, vector<2x1xf32>,
    %c1_i32 = arith.constant 1 : i32
    %16 = arith.cmpi eq, %arg0, %c1_i32 : i32
    %17 = arith.extui %16 : i1 to i32
    %c0_i32_13 = arith.constant 0 : i32
    %18 = arith.cmpi ne, %17, %c0_i32_13 : i32
    scf.if %18 {
      %c0_14 = arith.constant 0 : index
      %c0_15 = arith.constant 0 : index
      %19 = vector.load %arg3[%c0_14, %c0_15] : memref<2x16xf32, #tpu.memory_space<vmem>>, vector<2x16xf32>
      %c0_16 = arith.constant 0 : index
      %c0_17 = arith.constant 0 : index
      %20 = vector.load %arg4[%c0_16, %c0_17] : memref<2x1xf32, #tpu.memory_space<vmem>>, vector<2x1xf32>
      %21 = math.rsqrt %20 : vector<2x1xf32>
      %22 = vector.broadcast %21 : vector<2x1xf32> to vector<2x16xf32>
      %23 = arith.mulf %19, %22 : vector<2x16xf32>
      %cst_18 = arith.constant 1.000000e+00 : f32
      %24 = vector.broadcast %cst_18 : f32 to vector<2x16xf32>
      %25 = arith.subf %23, %24 : vector<2x16xf32>
      %cst_19 = arith.constant 1.000000e+01 : f32
      %26 = vector.broadcast %cst_19 : f32 to vector<2x16xf32>
      %27 = arith.mulf %26, %25 : vector<2x16xf32>
      %28 = math.exp %27 : vector<2x16xf32>
      %cst_20 = arith.constant dense<0.000000e+00> : vector<2xf32>
      %29 = vector.multi_reduction <add>, %28, %cst_20 [1] : vector<2x16xf32> to vector<2xf32>
      %30 = vector.shape_cast %29 : vector<2xf32> to vector<2x1xf32>
      %cst_21 = arith.constant 1.600000e+01 : f32
      %31 = vector.broadcast %cst_21 : f32 to vector<2x1xf32>
      %32 = arith.divf %30, %31 : vector<2x1xf32>
      %cst_22 = arith.constant dense<0x7F800000> : vector<2xf32>
      %33 = vector.multi_reduction <minimumf>, %28, %cst_22 [1] : vector<2x16xf32> to vector<2xf32>
      %34 = vector.shape_cast %33 : vector<2xf32> to vector<2x1xf32>
      %35 = vector.broadcast %32 : vector<2x1xf32> to vector<2x16xf32>
      %36 = arith.cmpf olt, %28, %35 : vector<2x16xf32>
      %37 = vector.shape_cast %34 : vector<2x1xf32> to vector<2x1xf32>
      %38 = vector.broadcast %37 : vector<2x1xf32> to vector<2x16xf32>
      %39 = arith.select %36, %38, %28 : vector<2x16xi1>, vector<2x16xf32>
      %c0_23 = arith.constant 0 : index
      %c0_24 = arith.constant 0 : index
      %40 = vector.load %arg3[%c0_23, %c0_24] : memref<2x16xf32, #tpu.memory_space<vmem>>, vector<2x16xf32>
      tpu.vector_store %arg3[%c0_23, %c0_24], %39 {strides = array<i32>} : memref<2x16xf32, #tpu.memory_space<vmem>>, vector<2x16xf32>,
    } else {
    }
    return
  }
  func.func @transform_0(%arg0: i32) -> (i32, i32) {
    %c0_i32 = arith.constant 0 : i32
    %c0_i32_0 = arith.constant 0 : i32
    return %c0_i32, %arg0 : i32, i32
  }
  func.func @transform_1(%arg0: i32) -> (i32, i32) {
    %c0_i32 = arith.constant 0 : i32
    %c0_i32_0 = arith.constant 0 : i32
    return %arg0, %c0_i32 : i32, i32
  }
  func.func @transform_2(%arg0: i32) -> (i32, i32) {
    %c0_i32 = arith.constant 0 : i32
    %c0_i32_0 = arith.constant 0 : i32
    %c0_i32_1 = arith.constant 0 : i32
    return %c0_i32, %c0_i32_0 : i32, i32
  }
}

</mosaic_0001>

<bundles_post_ra>
// kernel: tpu_custom_call.1
= control target key start
LH: loop header
LB: loop body
LE: loop exit
PB: predicated region body
PF: predicated region fallthrough
CT: control target
= control target key end

     0   :  { %7 = vsyncpa [#allocation4], 0  ;;  %s857_s9 = smov 0   ;;  %s948_s0 = inlined_call_operand.vmem [shape: f32[2,1024], index: 0, kind: input, shape index: {}]   ;;  %s949_s1 = inlined_call_operand.vmem [shape: bf16[1024,16], index: 1, kind: input, shape index: {}]   ;;  %s950_s2 = inlined_call_operand.hbm [shape: f32[2,16], index: 2, kind: output, shape index: {}]  }
   0x1 LB: > { %s863_s10 = sadd.s32 4294967295, %s836_s9   ;;  %p656_p0 = scmp.ge.s32.totalorder %s836_s9, 1  ;;  %s836_s9 = sphi %s857_s9, %s13_s9  }
   0x2   : > { %p120_p1 = scmp.lt.s32.totalorder %s836_s9, 3 }
   0x4   : > { %p121_p2 = pnand %p656_p0, %p120_p1 }
   0x5   : > { %s657_s11 = sshll.u32 (!%p121_p2), %s863_s10, 2  ;;  %s659_s12 = sshll.u32 (!%p121_p2), %s863_s10, 6 }
   0x6   : > { %124 = sbr.rel (%p121_p2) target bundleno = 528 (0x210), region = 28  ;;  %p143_p3 = scmp.lt.s32.totalorder (!%p121_p2), %s657_s11, 7 }
   0x7   : > { %p149_p4 = scmp.lt.s32.totalorder (!%p121_p2), %s659_s12, 127  ;;  %p661_p5 = scmp.ne.s32.totalorder (!%p121_p2), %s863_s10, 0 }
   0xd   : > { %s952_s11 = smov (!%p143_p3, %s657_s11), 7  ;;  %s954_s12 = smov (!%p149_p4, %s659_s12), 127 }
   0xe   : > { %s658_s13 = sshll.u32 %s952_s11, 1  ;;  %s660_s17 = sshll.u32 %s954_s12, 2  ;;  %vm159_vm0 = vcmask (!%p661_p5), 123904   ;;  %vm161_vm1 = vcmask (!%p661_p5), 1024   ;;  %v838_v0 = vmov (!%p661_p5), 0.0  }
   0xf   : > { %s872_s16 = scalar_lea.vmem %s948_s0, %s658_s13  ;;  %s877_s20 = scalar_lea.vmem %s949_s1, %s660_s17  ;;  %160 = vst.msk [vmem:[#allocation3] sm:$0x3] (!%p661_p5), %vm159_vm0, %v838_v0 }
  0x10   : > { %158 = sbr.rel (%p661_p5) target bundleno = 23 (0x17), region = 32  ;;  %162 = vst.msk [vmem:[#allocation2] sm:$0x3] (!%p661_p5), %vm161_vm1, %v838_v0 }
  0x17 PF: > { %v762_v1 = vld [vmem:[%s877_s20 + $0x40] sm:$0xff]   ;;  %v766_v5 = vld [vmem:[%s877_s20 + $0x48] sm:$0xff]   ;;  %v770_v9 = vld [vmem:[%s877_s20 + $0x50] sm:$0xff]   ;;  %v170_v31 = vlaneseq  ;;  %v839_v35 = vmov 1983009808   ;;  %vm554_vm2 = vcmask 1041408  }
  0x18   : > { %v763_v2 = vld [vmem:[%s877_s20 + $0xc0] sm:$0xff]   ;;  %700 = vmatprep.subr.bf16.mxu0 %v762_v1  ;;  %v767_v6 = vld [vmem:[%s877_s20 + $0xc8] sm:$0xff]   ;;  %v771_v10 = vld [vmem:[%s877_s20 + $0xd0] sm:$0xff]   ;;  %v168_v36 = vunpack.c.l.s4 %v839_v35  ;;  %vm565_vm3 = vcmask 1024   ;;  %vm528_vm4 = vcmask 123904   ;;  %p694_p6 = scmp.ne.s32.totalorder %s863_s10, 1 }
  0x19   : > { %v764_v3 = vld [vmem:[%s877_s20] sm:$0xff]   ;;  %722 = vmatprep.subr.bf16.mxu1 %v763_v2  ;;  %v768_v7 = vld [vmem:[%s877_s20 + $0x8] sm:$0xff]   ;;  %v772_v11 = vld [vmem:[%s877_s20 + $0x10] sm:$0xff]   ;;  %v171_v37 = vshrl.u32 %v170_v31, 7 }
  0x1a   : > { %v765_v4 = vld [vmem:[%s877_s20 + $0x80] sm:$0xff]   ;;  %701 = vmatpush3.bf16.msra.mxu0 %v764_v3  ;;  %v769_v8 = vld [vmem:[%s877_s20 + $0x88] sm:$0xff]   ;;  %v773_v12 = vld [vmem:[%s877_s20 + $0x90] sm:$0xff]   ;;  %v169_v39 = vunpack.c.0.s8 %v168_v36 }
  0x1b   : > { %723 = vmatpush3.bf16.msra.mxu1 %v765_v4  ;;  %702 = vmatprep.subr.bf16.mxu0 %v766_v5  ;;  %v774_v13 = vld [vmem:[%s877_s20 + $0x58] sm:$0xff]   ;;  %v778_v17 = vld [vmem:[%s877_s20 + $0x60] sm:$0xff]   ;;  %v782_v21 = vld [vmem:[%s877_s20 + $0x68] sm:$0xff]  }
  0x1c   : > { %724 = vmatprep.subr.bf16.mxu1 %v767_v6  ;;  %v775_v14 = vld [vmem:[%s877_s20 + $0xd8] sm:$0xff]   ;;  %v779_v18 = vld [vmem:[%s877_s20 + $0xe0] sm:$0xff]   ;;  %v783_v22 = vld [vmem:[%s877_s20 + $0xe8] sm:$0xff]   ;;  %v172_v42 = vsub.s32 %v169_v39, %v171_v37 }
  0x1d   : > { %v776_v15 = vld [vmem:[%s877_s20 + $0x18] sm:$0xff]   ;;  %v780_v19 = vld [vmem:[%s877_s20 + $0x20] sm:$0xff]   ;;  %v784_v23 = vld [vmem:[%s877_s20 + $0x28] sm:$0xff]  }
  0x1e   : > { %703 = vmatpush3.bf16.msra.mxu0 %v768_v7  ;;  %v777_v16 = vld [vmem:[%s877_s20 + $0x98] sm:$0xff]   ;;  %v781_v20 = vld [vmem:[%s877_s20 + $0xa0] sm:$0xff]   ;;  %v785_v24 = vld [vmem:[%s877_s20 + $0xa8] sm:$0xff]  }
  0x1f   : > { %725 = vmatpush3.bf16.msra.mxu1 %v769_v8  ;;  %704 = vmatprep.subr.bf16.mxu0 %v770_v9  ;;  %v786_v25 = vld [vmem:[%s877_s20 + $0x70] sm:$0xff]   ;;  %v790_v29 = vld [vmem:[%s877_s20 + $0x78] sm:$0xff]   ;;  %v163_v34 = vld [vmem:[%s872_s16] sm:$0xff] }
  0x20   : > { %726 = vmatprep.subr.bf16.mxu1 %v771_v10  ;;  %v787_v26 = vld [vmem:[%s877_s20 + $0xf0] sm:$0xff]   ;;  %v791_v30 = vld [vmem:[%s877_s20 + $0xf8] sm:$0xff]   ;;  %v531_v38 = vmul.f32 %v163_v34, %v163_v34  ;;  %v166_v40 = vcombine.high %v163_v34, %v163_v34  ;;  %v173_v43 = vrot.slane %v163_v34, %v172_v42  ;;  %v530_v62 = vld [vmem:[#allocation2] sm:$0x3] }
  0x21   : > { %v788_v27 = vld [vmem:[%s877_s20 + $0x30] sm:$0xff]   ;;  %v792_v32 = vld [vmem:[%s877_s20 + $0x38] sm:$0xff]   ;;  %v164_v9 = vld [vmem:[#allocation3] sm:$0x3] }
  0x22   : > { %705 = vmatpush3.bf16.msra.mxu0 %v772_v11  ;;  %v789_v28 = vld [vmem:[%s877_s20 + $0xb0] sm:$0xff]   ;;  %v793_v33 = vld [vmem:[%s877_s20 + $0xb8] sm:$0xff]   ;;  %v533_v41 = vcombine.high %v531_v38, %v531_v38  ;;  %v180_v44 = vrot.slane %v166_v40, %v172_v42  ;;  %v540_v45 = vrot.slane %v531_v38, %v172_v42  ;;  %v181_v47 = vcombine.high %v173_v43, %v173_v43 }
  0x23   : > { %727 = vmatpush3.bf16.msra.mxu1 %v773_v12  ;;  %706 = vmatprep.subr.bf16.mxu0 %v774_v13  ;;  %v187_v49 = vpack.c.bf16 %v173_v43, %v173_v43 }
  0x24   : > { %728 = vmatprep.subr.bf16.mxu1 %v775_v14  ;;  %v547_v46 = vrot.slane %v533_v41, %v172_v42  ;;  %v182_v48 = vcombine.high %v180_v44, %v180_v44  ;;  %v189_v50 = vpack.c.bf16 %v180_v44, %v180_v44  ;;  %v548_v51 = vcombine.high %v540_v45, %v540_v45 }
  0x25   : > { %v555_v53 = vsel %vm554_vm2, %v540_v45, 0.0  ;;  %v188_v54 = vpack.c.bf16 %v181_v47, %v181_v47 }
  0x26   : > { %707 = vmatpush3.bf16.msra.mxu0 %v776_v15  ;;  %v549_v52 = vcombine.high %v547_v46, %v547_v46  ;;  %v190_v55 = vpack.c.bf16 %v182_v48, %v182_v48  ;;  %v556_v56 = vsel %vm554_vm2, %v548_v51, 0.0  ;;  %v558_v57 = vsel %vm554_vm2, %v547_v46, 0.0 }
  0x27   : > { %729 = vmatpush3.bf16.msra.mxu1 %v777_v16  ;;  %708 = vmatprep.subr.bf16.mxu0 %v778_v17  ;;  %v557_v58 = vadd.f32 %v556_v56, %v555_v53  ;;  %v840_v15 = vmov (!%p694_p6), 0  }
  0x28   : > { %730 = vmatprep.subr.bf16.mxu1 %v779_v18  ;;  %479 = vmatprep.mubr.bf16.mxu0 %v188_v54  ;;  %v560_v59 = vsel %vm554_vm2, %v549_v52, 0.0 }
  0x29   : > { %519 = vmatprep.mubr.bf16.mxu1 %v190_v55  ;;  %v559_v60 = vadd.f32 %v558_v57, %v557_v58  ;;  %795 = vset.pattern.permute.xlu0 (!%p694_p6), %v840_v15 }
  0x2a   : > { %709 = vmatpush3.bf16.msra.mxu0 %v780_v19 }
  0x2b   : > { %731 = vmatpush3.bf16.msra.mxu1 %v781_v20  ;;  %710 = vmatprep.subr.bf16.mxu0 %v782_v21  ;;  %v561_v61 = vadd.f32 %v560_v59, %v559_v60 }
  0x2c   : > { %732 = vmatprep.subr.bf16.mxu1 %v783_v22 }
  0x2d   : > { %562 = vadd.xlane.f32.xlu0 %v561_v61 }
  0x2e   : > { %711 = vmatpush3.bf16.msra.mxu0 %v784_v23 }
  0x2f   : > { %733 = vmatpush3.bf16.msra.mxu1 %v785_v24  ;;  %712 = vmatprep.subr.bf16.mxu0 %v786_v25 }
  0x30   : > { %734 = vmatprep.subr.bf16.mxu1 %v787_v26 }
  0x32   : > { %713 = vmatpush3.bf16.msra.mxu0 %v788_v27 }
  0x33   : > { %735 = vmatpush3.bf16.msra.mxu1 %v789_v28  ;;  %714 = vmatprep.subr.bf16.mxu0 %v790_v29 }
  0x34   : > { %736 = vmatprep.subr.bf16.mxu1 %v791_v30 }
  0x36   : > { %715 = vmatpush3.bf16.msra.mxu0 %v792_v32 }
  0x37   : > { %737 = vmatpush3.bf16.msra.mxu1 %v793_v33 }
  0x39   : > { %480 = vmatmul.mubr.bf16.vlgmr.msra.gmra.mrb[0].mxu0 %v187_v49 }
  0x3a   : > { %520 = vmatmul.mubr.bf16.vlgmr.msra.gmra.mrb[0].mxu1 %v189_v50 }
  0xba   : > { %v563_v63 = vpop.xlane.xlu0 %562 }
  0xbb   : > { %v564_v0 = vadd.f32 %v563_v63, %v530_v62 }
  0xbd   : > { %566 = vst.msk [vmem:[#allocation2] sm:$0x3] %vm565_vm3, %v564_v0 }
  0xc4   : > { %v572_v14 = vld [vmem:[#allocation2] sm:$0x3] (!%p694_p6) }
  0xc5   : > { %796 = vrsqrt.f32 (!%p694_p6), %v572_v14 }
  0xcf   : > { %v797_v16 = vpop.eup (!%p694_p6), %796 }
  0xd0   : > { %576 = vperm.xlu0 (!%p694_p6), %795, %v797_v16  }
 0x10c   : > { %v716_v1 = vpop.f32.mrb[0].mxu0 }
 0x10d   : > { %v738_v2 = vpop.f32.mrb[0].mxu1  ;;  %v717_v3 = vpop.f32.mrb[1].mxu0 }
 0x10e   : > { %v739_v4 = vpop.f32.mrb[1].mxu1  ;;  %v718_v5 = vadd.f32 %v717_v3, %v716_v1  ;;  %v719_v7 = vpop.f32.mrb[2].mxu0 }
 0x10f   : > { %v740_v6 = vadd.f32 %v739_v4, %v738_v2  ;;  %v741_v8 = vpop.f32.mrb[2].mxu1  ;;  %v720_v10 = vpop.f32.mrb[3].mxu0  ;;  %570 = sbr.rel (%p694_p6) target bundleno = 503 (0x1f7), region = 36 }
 0x110   : > { %v742_v11 = vpop.f32.mrb[3].mxu1 }
 0x111   : > { %v522_v12 = vadd.f32 %v740_v6, %v718_v5 }
 0x113   : > { %v527_v13 = vadd.f32 %v522_v12, %v164_v9 }
 0x115   : > { %529 = vst.msk [vmem:[#allocation3] sm:$0x3] %vm528_vm4, %v527_v13 }
 0x11c   : > { %v571_v17 = vld [vmem:[#allocation3] sm:$0x3] }
 0x14f   : > { %v577_v18 = vpop.permute.xlu0 %576 }
 0x150   : > { %v579_v19 = vmul.f32 %v577_v18, %v571_v17 }
 0x152   : > { %v695_v20 = vadd.f32 -1.0, %v579_v19 }
 0x154   : > { %v581_v21 = vmul.f32 10.0, %v695_v20 }
 0x156   : > { %v582_v22 = vmul.f32 1.442695, %v581_v21 }
 0x158   : > { %798 = vpow2.f32 %v582_v22 }
 0x162   : > { %v799_v23 = vpop.eup %798 }
 0x163   : > { %v589_v24 = vsel %vm528_vm4, %v799_v23, inf  ;;  %v584_v25 = vsel %vm528_vm4, %v799_v23, 0.0 }
 0x164   : > { %590 = vmin.xlane.f32.xlu1 %v589_v24  ;;  %585 = vadd.xlane.f32.xlu0 %v584_v25 }
 0x1f1   : > { %v586_v26 = vpop.xlane.xlu0 %585  ;;  %v591_v28 = vpop.xlane.xlu1 %590 }
 0x1f2   : > { %v588_v27 = vmul.f32 0.0625, %v586_v26 }
 0x1f4   : > { %vm592_vm5 = vcmp.lt.f32.partialorder %v799_v23, %v588_v27 }
 0x1f5   : > { %v593_v29 = vsel %vm592_vm5, %v591_v28, %v799_v23 }
 0x1f6   : > { %594 = vst.msk [vmem:[#allocation3] sm:$0x3] %vm528_vm4, %v593_v29 }
 0x1f7 PF: > { %p748_p7 = scmp.eq.s32.totalorder %s863_s10, 1  ;;  %s841_s21 = smov [#allocation3]  }
 0x1f8   : > { %s602_s22 = sshll.u32 %s841_s21, 4  ;;  %s603_s22 = int_to_ptr.vmem [resolvable:$true] %s602_s22 }
 0x1f9   : > { %s800_s23 = scalar_lea.vmem %s603_s22, 32  ;;  %p807_p11 = scmp.lt.s32.totalorder %s603_s22, %s603_s22 }
 0x1fa   : > { %p801_p8 = scmp.ne.s32.totalorder %s603_s22, %s800_s23  ;;  %p808_p12 = scmp.lt.s32.totalorder %s800_s23, %s800_s23 }
 0x1fc   : > { %p802_p9 = pnand %p801_p8, %p748_p7  ;;  %p809_p13 = por %p808_p12, %p807_p11 }
 0x1fe   : > { %p803_p10 = pneg %p802_p9 }
 0x200   : > { %p810_p0 = pnand %p809_p13, %p803_p10 }
 0x202   : > { %813 = shalt.err (!%p810_p0)
}
 0x203   : > { %s814_s26 = scalar_lea.hbm %s950_s2, 32 }
 0x204   : > { %p815_p1 = scmp.ne.s32.totalorder %s950_s2, %s814_s26  ;;  %p820_p4 = scmp.lt.u32.totalorder %s814_s26, %s950_s2 }
 0x206   : > { %p816_p2 = pnand %p815_p1, %p748_p7 }
 0x208   : > { %p817_p3 = pneg %p816_p2 }
 0x20a   : > { %p822_p5 = pnand %p820_p4, %p817_p3 }
 0x20c   : > { %825 = shalt.err (!%p822_p5)
}
 0x20d   : > { %745 = dma.vmem_to_hbm [thread:$0]  (%p748_p7), %s603_s22, 32, %s950_s2, [#allocation4]  }
 0x20e   : > { %831 = dma.done.wait (%p748_p7), [#allocation4], 32  }
 0x20f   : > { %833 = vsyncadd (%p748_p7), [#allocation4], 4294967264 }
 0x210 PF: > { %s13_s9 = sadd.s32 1, %s836_s9  }
 0x211   : > { %p10_p6 = scmp.ge.s32.totalorder %s13_s9, 4  }
 0x213   :  { %12 = sbr.rel (!%p10_p6) target bundleno = 1 (0x1), region = 66 }
 0x21a   :  { %615 = vsyncpa [#allocation4], 1 }
 0x21b   :  { %617 = vsyncpa [#allocation4 + $0x1], 1 }

</bundles_post_ra>
